<compile_context>
chip_gen: v5e
topology: v5e:2x2
jax: 0.10.0
libtpu: 0.0.40
codegen_flags: <defaults>
</compile_context>

<pallas_src>
import jax
import jax.numpy as jnp
from jax.experimental import pallas as pl
from jax.experimental.pallas import tpu as pltpu


def _double_conv_kernel(x_ref, m1_ref, b1_ref, m2_ref, b2_ref, o_ref):
    # x_ref:  (H, W*Cin)           bf16, one batch element (no padding anywhere)
    # m1_ref: (3, W*Cin, W*Cmid)   bf16 banded weights, indexed by dy
    # b1_ref: (1, W*Cmid)          f32  bias tiled across W
    # m2_ref: (3, W*Cmid, W*Cout)  bf16 banded weights
    # b2_ref: (1, W*Cout)          f32
    # o_ref:  (H, W*Cout)          f32, lane-dense output slab
    H = x_ref.shape[0]

    # Row-shift operators (vertical pad=1 of both convs), applied on the MXU.
    #   shift_dn @ t  ->  out[h] = t[h-1]  (zero at h = 0)
    #   shift_up @ t  ->  out[h] = t[h+1]  (zero at h = H-1)
    row = jax.lax.broadcasted_iota(jnp.int32, (H, H), 0)
    col = jax.lax.broadcasted_iota(jnp.int32, (H, H), 1)
    shift_dn = (col == row - 1).astype(jnp.float32)
    shift_up = (col == row + 1).astype(jnp.float32)

    def conv3x3(inp, m_ref, b_ref):
        # inp: (H, W*Ci) bf16 ; m_ref: (3, W*Ci, W*Co) bf16 ; b_ref: (1, W*Co) f32
        t0 = jnp.dot(inp, m_ref[0], preferred_element_type=jnp.float32)  # dy = 0
        t1 = jnp.dot(inp, m_ref[1], preferred_element_type=jnp.float32)  # dy = 1
        t2 = jnp.dot(inp, m_ref[2], preferred_element_type=jnp.float32)  # dy = 2
        acc = (t1
               + jnp.dot(shift_dn, t0, preferred_element_type=jnp.float32)
               + jnp.dot(shift_up, t2, preferred_element_type=jnp.float32))
        acc = acc + b_ref[...]
        return jnp.maximum(acc * 0.2, acc)          # leaky ReLU (slope 0.2), f32

    y1 = conv3x3(x_ref[...], m1_ref, b1_ref).astype(jnp.bfloat16)
    y2 = conv3x3(y1, m2_ref, b2_ref)
    o_ref[...] = y2.astype(o_ref.dtype)


def double_conv2d(x_nchw, w1, b1, w2, b2):
    """Forward of Double_Conv2d. x_nchw: (N, Cin, H, W); weights in PyTorch OIHW layout."""
    N, Cin, H, W = x_nchw.shape
    Cmid = w1.shape[0]
    Cout = w2.shape[0]

    # NCHW -> NHWC -> (N, H, W*Cin); bf16 activations (f32 accumulation in-kernel).
    x = jnp.transpose(x_nchw, (0, 2, 3, 1)).reshape(N, H, W * Cin).astype(jnp.bfloat16)

    # OIHW -> HWIO
    w1_hwio = jnp.transpose(w1, (2, 3, 1, 0)).astype(jnp.float32)   # (3,3,Cin,Cmid)
    w2_hwio = jnp.transpose(w2, (2, 3, 1, 0)).astype(jnp.float32)   # (3,3,Cmid,Cout)

    # Banded weight matrices: fold the dx tap + channel contraction (and the
    # horizontal pad=1, via band truncation) into the matmul K dimension.
    #   S[dx, wi, wo] = 1  iff  wi == wo + dx - 1
    #   M[dy, wi*Ci+ci, wo*Co+co] = w[dy, dx=wi-wo+1, ci, co]
    S = jnp.stack([jnp.eye(W, W, k=1 - dx, dtype=jnp.float32) for dx in range(3)])

    def banded(w_hwio, ci, co):
        m = jnp.einsum('xab,yxio->yaibo', S, w_hwio)        # (3, W, ci, W, co)
        return m.reshape(3, W * ci, W * co).astype(jnp.bfloat16)

    m1 = banded(w1_hwio, Cin, Cmid)     # (3, W*Cin,  W*Cmid)
    m2 = banded(w2_hwio, Cmid, Cout)    # (3, W*Cmid, W*Cout)

    b1_flat = jnp.tile(b1.astype(jnp.float32), W).reshape(1, W * Cmid)
    b2_flat = jnp.tile(b2.astype(jnp.float32), W).reshape(1, W * Cout)

    out_flat = pl.pallas_call(
        _double_conv_kernel,
        out_shape=jax.ShapeDtypeStruct((N, H, W * Cout), jnp.float32),
        grid_spec=pltpu.PrefetchScalarGridSpec(
            num_scalar_prefetch=0,
            grid=(N,),
            in_specs=[
                pl.BlockSpec((None, H, W * Cin), lambda n: (n, 0, 0)),
                # Constant index_map -> weights stay resident, not re-fetched per step.
                pl.BlockSpec((3, W * Cin, W * Cmid), lambda n: (0, 0, 0)),
                pl.BlockSpec((1, W * Cmid), lambda n: (0, 0)),
                pl.BlockSpec((3, W * Cmid, W * Cout), lambda n: (0, 0, 0)),
                pl.BlockSpec((1, W * Cout), lambda n: (0, 0)),
            ],
            out_specs=pl.BlockSpec((None, H, W * Cout), lambda n: (n, 0, 0)),
        ),
        compiler_params=pltpu.CompilerParams(
            dimension_semantics=("parallel",),       # batch elems independent -> megacore
            vmem_limit_bytes=32 * 1024 * 1024,
        ),
    )(x, m1, b1_flat, m2, b2_flat)

    # (N, H, W*Cout) -> NHWC -> NCHW to match the PyTorch output convention.
    return jnp.transpose(out_flat.reshape(N, H, W, Cout), (0, 3, 1, 2))


def _reference(x_nchw, w1, b1, w2, b2):
    """Pure-JAX f32 reference of Double_Conv2d (NCHW, OIHW)."""
    def conv(x, w):
        dn = jax.lax.conv_dimension_numbers(x.shape, w.shape, ("NCHW", "OIHW", "NCHW"))
        return jax.lax.conv_general_dilated(x, w, (1, 1), ((1, 1), (1, 1)),
                                            dimension_numbers=dn)
    y = conv(x_nchw, w1) + b1.reshape(1, -1, 1, 1)
    y = jnp.maximum(y * 0.2, y)
    y = conv(y, w2) + b2.reshape(1, -1, 1, 1)
    return jnp.maximum(y * 0.2, y)


if __name__ == "__main__":
    # Small deterministic setup: batch=2, in_channel=4, out_channel=8, spatial=16.
    N, Cin, Cout, H, W = 2, 4, 8, 16, 16
    key = jax.random.PRNGKey(0)
    kx, kw1, kb1, kw2, kb2 = jax.random.split(key, 5)

    x = jax.random.normal(kx, (N, Cin, H, W), jnp.float32)
    # PyTorch layouts: OIHW weights, (C,) biases.
    w1 = jax.random.normal(kw1, (Cout, Cin, 3, 3), jnp.float32) * 0.1
    b1 = jax.random.normal(kb1, (Cout,), jnp.float32) * 0.1
    w2 = jax.random.normal(kw2, (Cout, Cout, 3, 3), jnp.float32) * 0.1
    b2 = jax.random.normal(kb2, (Cout,), jnp.float32) * 0.1

    out = double_conv2d(x, w1, b1, w2, b2)
    out = jax.block_until_ready(out)

    ref = _reference(x, w1, b1, w2, b2)
    assert out.shape == (N, Cout, H, W), out.shape
    # Kernel computes in bf16 with f32 accumulation; tolerance loosened accordingly.
    assert jnp.allclose(out, ref, atol=5e-2, rtol=5e-2), "mismatch vs JAX reference"

    print("KERNEL_OK")
</pallas_src>

<mosaic_0001>
module attributes {stable_mosaic.version = 11 : i64} {
  func.func @_double_conv_kernel(%arg0: i32, %arg1: memref<1x16x64xbf16, #tpu.memory_space<vmem>>, %arg2: memref<3x64x128xbf16, #tpu.memory_space<vmem>>, %arg3: memref<1x128xf32, #tpu.memory_space<vmem>>, %arg4: memref<3x128x128xbf16, #tpu.memory_space<vmem>>, %arg5: memref<1x128xf32, #tpu.memory_space<vmem>>, %arg6: memref<1x16x128xf32, #tpu.memory_space<vmem>>) attributes {dimension_semantics = [#tpu.dimension_semantics<parallel>], iteration_bounds = array<i64: 2>, scalar_prefetch = 0 : i64, scratch_operands = 0 : i64, tpu.core_type = #tpu.core_type<tc>, window_params = [{transform_indices = @transform_0, window_bounds = array<i64: 1, 16, 64>}, {pipeline_mode = #tpu.pipeline_mode<synchronous>, transform_indices = @transform_1, window_bounds = array<i64: 3, 64, 128>}, {pipeline_mode = #tpu.pipeline_mode<synchronous>, transform_indices = @transform_2, window_bounds = array<i64: 1, 128>}, {pipeline_mode = #tpu.pipeline_mode<synchronous>, transform_indices = @transform_3, window_bounds = array<i64: 3, 128, 128>}, {pipeline_mode = #tpu.pipeline_mode<synchronous>, transform_indices = @transform_4, window_bounds = array<i64: 1, 128>}, {transform_indices = @transform_5, window_bounds = array<i64: 1, 16, 128>}]} {
    %0 = tpu.iota {dimensions = array<i32: 0>} : vector<16x16xi32>
    %1 = tpu.iota {dimensions = array<i32: 1>} : vector<16x16xi32>
    %c1_i32 = arith.constant 1 : i32
    %2 = vector.broadcast %c1_i32 : i32 to vector<16x16xi32>
    %3 = arith.subi %0, %2 : vector<16x16xi32>
    %4 = arith.cmpi eq, %1, %3 : vector<16x16xi32>
    %5 = arith.extui %4 : vector<16x16xi1> to vector<16x16xi32>
    %6 = arith.sitofp %5 : vector<16x16xi32> to vector<16x16xf32>
    %c1_i32_0 = arith.constant 1 : i32
    %7 = vector.broadcast %c1_i32_0 : i32 to vector<16x16xi32>
    %8 = arith.addi %0, %7 : vector<16x16xi32>
    %9 = arith.cmpi eq, %1, %8 : vector<16x16xi32>
    %10 = arith.extui %9 : vector<16x16xi1> to vector<16x16xi32>
    %11 = arith.sitofp %10 : vector<16x16xi32> to vector<16x16xf32>
    %c0 = arith.constant 0 : index
    %c0_1 = arith.constant 0 : index
    %c0_2 = arith.constant 0 : index
    %12 = vector.load %arg1[%c0, %c0_1, %c0_2] : memref<1x16x64xbf16, #tpu.memory_space<vmem>>, vector<1x16x64xbf16>
    %13 = vector.shape_cast %12 : vector<1x16x64xbf16> to vector<16x64xbf16>
    %c0_3 = arith.constant 0 : index
    %c0_4 = arith.constant 0 : index
    %c0_5 = arith.constant 0 : index
    %14 = vector.load %arg2[%c0_3, %c0_4, %c0_5] : memref<3x64x128xbf16, #tpu.memory_space<vmem>>, vector<1x64x128xbf16>
    %15 = vector.shape_cast %14 : vector<1x64x128xbf16> to vector<64x128xbf16>
    %cst = arith.constant dense<0.000000e+00> : vector<16x128xf32>
    %16 = tpu.matmul %13, %15, %cst {dimension_numbers = #tpu.dot_dimension_numbers<[1], [0], [0], [1], [0, 0, 1, 1], [], []>} : vector<16x64xbf16>, vector<64x128xbf16>, vector<16x128xf32> -> vector<16x128xf32>
    %c1 = arith.constant 1 : index
    %c0_6 = arith.constant 0 : index
    %c0_7 = arith.constant 0 : index
    %17 = vector.load %arg2[%c1, %c0_6, %c0_7] : memref<3x64x128xbf16, #tpu.memory_space<vmem>>, vector<1x64x128xbf16>
    %18 = vector.shape_cast %17 : vector<1x64x128xbf16> to vector<64x128xbf16>
    %cst_8 = arith.constant dense<0.000000e+00> : vector<16x128xf32>
    %19 = tpu.matmul %13, %18, %cst_8 {dimension_numbers = #tpu.dot_dimension_numbers<[1], [0], [0], [1], [0, 0, 1, 1], [], []>} : vector<16x64xbf16>, vector<64x128xbf16>, vector<16x128xf32> -> vector<16x128xf32>
    %c2 = arith.constant 2 : index
    %c0_9 = arith.constant 0 : index
    %c0_10 = arith.constant 0 : index
    %20 = vector.load %arg2[%c2, %c0_9, %c0_10] : memref<3x64x128xbf16, #tpu.memory_space<vmem>>, vector<1x64x128xbf16>
    %21 = vector.shape_cast %20 : vector<1x64x128xbf16> to vector<64x128xbf16>
    %cst_11 = arith.constant dense<0.000000e+00> : vector<16x128xf32>
    %22 = tpu.matmul %13, %21, %cst_11 {dimension_numbers = #tpu.dot_dimension_numbers<[1], [0], [0], [1], [0, 0, 1, 1], [], []>} : vector<16x64xbf16>, vector<64x128xbf16>, vector<16x128xf32> -> vector<16x128xf32>
    %cst_12 = arith.constant dense<0.000000e+00> : vector<16x128xf32>
    %23 = tpu.matmul %6, %16, %cst_12 {dimension_numbers = #tpu.dot_dimension_numbers<[1], [0], [0], [1], [0, 0, 1, 1], [], []>} : vector<16x16xf32>, vector<16x128xf32>, vector<16x128xf32> -> vector<16x128xf32>
    %24 = arith.addf %19, %23 : vector<16x128xf32>
    %cst_13 = arith.constant dense<0.000000e+00> : vector<16x128xf32>
    %25 = tpu.matmul %11, %22, %cst_13 {dimension_numbers = #tpu.dot_dimension_numbers<[1], [0], [0], [1], [0, 0, 1, 1], [], []>} : vector<16x16xf32>, vector<16x128xf32>, vector<16x128xf32> -> vector<16x128xf32>
    %26 = arith.addf %24, %25 : vector<16x128xf32>
    %c0_14 = arith.constant 0 : index
    %c0_15 = arith.constant 0 : index
    %27 = vector.load %arg3[%c0_14, %c0_15] : memref<1x128xf32, #tpu.memory_space<vmem>>, vector<1x128xf32>
    %28 = vector.broadcast %27 : vector<1x128xf32> to vector<16x128xf32>
    %29 = arith.addf %26, %28 : vector<16x128xf32>
    %cst_16 = arith.constant 2.000000e-01 : f32
    %30 = vector.broadcast %cst_16 : f32 to vector<16x128xf32>
    %31 = arith.mulf %29, %30 : vector<16x128xf32>
    %32 = arith.maximumf %31, %29 : vector<16x128xf32>
    %33 = arith.truncf %32 : vector<16x128xf32> to vector<16x128xbf16>
    %c0_17 = arith.constant 0 : index
    %c0_18 = arith.constant 0 : index
    %c0_19 = arith.constant 0 : index
    %34 = vector.load %arg4[%c0_17, %c0_18, %c0_19] : memref<3x128x128xbf16, #tpu.memory_space<vmem>>, vector<1x128x128xbf16>
    %35 = vector.shape_cast %34 : vector<1x128x128xbf16> to vector<128x128xbf16>
    %cst_20 = arith.constant dense<0.000000e+00> : vector<16x128xf32>
    %36 = tpu.matmul %33, %35, %cst_20 {dimension_numbers = #tpu.dot_dimension_numbers<[1], [0], [0], [1], [0, 0, 1, 1], [], []>} : vector<16x128xbf16>, vector<128x128xbf16>, vector<16x128xf32> -> vector<16x128xf32>
    %c1_21 = arith.constant 1 : index
    %c0_22 = arith.constant 0 : index
    %c0_23 = arith.constant 0 : index
    %37 = vector.load %arg4[%c1_21, %c0_22, %c0_23] : memref<3x128x128xbf16, #tpu.memory_space<vmem>>, vector<1x128x128xbf16>
    %38 = vector.shape_cast %37 : vector<1x128x128xbf16> to vector<128x128xbf16>
    %cst_24 = arith.constant dense<0.000000e+00> : vector<16x128xf32>
    %39 = tpu.matmul %33, %38, %cst_24 {dimension_numbers = #tpu.dot_dimension_numbers<[1], [0], [0], [1], [0, 0, 1, 1], [], []>} : vector<16x128xbf16>, vector<128x128xbf16>, vector<16x128xf32> -> vector<16x128xf32>
    %c2_25 = arith.constant 2 : index
    %c0_26 = arith.constant 0 : index
    %c0_27 = arith.constant 0 : index
    %40 = vector.load %arg4[%c2_25, %c0_26, %c0_27] : memref<3x128x128xbf16, #tpu.memory_space<vmem>>, vector<1x128x128xbf16>
    %41 = vector.shape_cast %40 : vector<1x128x128xbf16> to vector<128x128xbf16>
    %cst_28 = arith.constant dense<0.000000e+00> : vector<16x128xf32>
    %42 = tpu.matmul %33, %41, %cst_28 {dimension_numbers = #tpu.dot_dimension_numbers<[1], [0], [0], [1], [0, 0, 1, 1], [], []>} : vector<16x128xbf16>, vector<128x128xbf16>, vector<16x128xf32> -> vector<16x128xf32>
    %cst_29 = arith.constant dense<0.000000e+00> : vector<16x128xf32>
    %43 = tpu.matmul %6, %36, %cst_29 {dimension_numbers = #tpu.dot_dimension_numbers<[1], [0], [0], [1], [0, 0, 1, 1], [], []>} : vector<16x16xf32>, vector<16x128xf32>, vector<16x128xf32> -> vector<16x128xf32>
    %44 = arith.addf %39, %43 : vector<16x128xf32>
    %cst_30 = arith.constant dense<0.000000e+00> : vector<16x128xf32>
    %45 = tpu.matmul %11, %42, %cst_30 {dimension_numbers = #tpu.dot_dimension_numbers<[1], [0], [0], [1], [0, 0, 1, 1], [], []>} : vector<16x16xf32>, vector<16x128xf32>, vector<16x128xf32> -> vector<16x128xf32>
    %46 = arith.addf %44, %45 : vector<16x128xf32>
    %c0_31 = arith.constant 0 : index
    %c0_32 = arith.constant 0 : index
    %47 = vector.load %arg5[%c0_31, %c0_32] : memref<1x128xf32, #tpu.memory_space<vmem>>, vector<1x128xf32>
    %48 = vector.broadcast %47 : vector<1x128xf32> to vector<16x128xf32>
    %49 = arith.addf %46, %48 : vector<16x128xf32>
    %cst_33 = arith.constant 2.000000e-01 : f32
    %50 = vector.broadcast %cst_33 : f32 to vector<16x128xf32>
    %51 = arith.mulf %49, %50 : vector<16x128xf32>
    %52 = arith.maximumf %51, %49 : vector<16x128xf32>
    %c0_34 = arith.constant 0 : index
    %c0_35 = arith.constant 0 : index
    %c0_36 = arith.constant 0 : index
    %53 = vector.load %arg6[%c0_34, %c0_35, %c0_36] : memref<1x16x128xf32, #tpu.memory_space<vmem>>, vector<1x16x128xf32>
    %54 = vector.shape_cast %53 : vector<1x16x128xf32> to vector<16x128xf32>
    %55 = vector.shape_cast %52 : vector<16x128xf32> to vector<1x16x128xf32>
    tpu.vector_store %arg6[%c0_34, %c0_35, %c0_36], %55 {strides = array<i32>} : memref<1x16x128xf32, #tpu.memory_space<vmem>>, vector<1x16x128xf32>,
    return
  }
  func.func @transform_0(%arg0: i32) -> (i32, i32, i32) {
    %c0_i32 = arith.constant 0 : i32
    %c0_i32_0 = arith.constant 0 : i32
    %c0_i32_1 = arith.constant 0 : i32
    return %arg0, %c0_i32, %c0_i32_0 : i32, i32, i32
  }
  func.func @transform_1(%arg0: i32) -> (i32, i32, i32) {
    %c0_i32 = arith.constant 0 : i32
    %c0_i32_0 = arith.constant 0 : i32
    %c0_i32_1 = arith.constant 0 : i32
    %c0_i32_2 = arith.constant 0 : i32
    return %c0_i32, %c0_i32_0, %c0_i32_1 : i32, i32, i32
  }
  func.func @transform_2(%arg0: i32) -> (i32, i32) {
    %c0_i32 = arith.constant 0 : i32
    %c0_i32_0 = arith.constant 0 : i32
    %c0_i32_1 = arith.constant 0 : i32
    return %c0_i32, %c0_i32_0 : i32, i32
  }
  func.func @transform_3(%arg0: i32) -> (i32, i32, i32) {
    %c0_i32 = arith.constant 0 : i32
    %c0_i32_0 = arith.constant 0 : i32
    %c0_i32_1 = arith.constant 0 : i32
    %c0_i32_2 = arith.constant 0 : i32
    return %c0_i32, %c0_i32_0, %c0_i32_1 : i32, i32, i32
  }
  func.func @transform_4(%arg0: i32) -> (i32, i32) {
    %c0_i32 = arith.constant 0 : i32
    %c0_i32_0 = arith.constant 0 : i32
    %c0_i32_1 = arith.constant 0 : i32
    return %c0_i32, %c0_i32_0 : i32, i32
  }
  func.func @transform_5(%arg0: i32) -> (i32, i32, i32) {
    %c0_i32 = arith.constant 0 : i32
    %c0_i32_0 = arith.constant 0 : i32
    %c0_i32_1 = arith.constant 0 : i32
    return %arg0, %c0_i32, %c0_i32_0 : i32, i32, i32
  }
}

</mosaic_0001>

<bundles_post_ra>
// kernel: tpu_custom_call.1
= control target key start
LH: loop header
LB: loop body
LE: loop exit
PB: predicated region body
PF: predicated region fallthrough
CT: control target
= control target key end

     0   :  { %10 = vsyncpa [#allocation3], 0  ;;  %s1603_s0 = inlined_call_operand.hbm [shape: bf16[2,16,64], index: 0, kind: input, shape index: {}]   ;;  %s1604_s1 = inlined_call_operand.hbm [shape: bf16[3,64,128], index: 1, kind: input, shape index: {}]   ;;  %s1605_s2 = inlined_call_operand.vmem [shape: f32[1,128], index: 2, kind: input, shape index: {}]   ;;  %s1606_s3 = inlined_call_operand.hbm [shape: bf16[3,128,128], index: 3, kind: input, shape index: {}]   ;;  %s1607_s4 = inlined_call_operand.vmem [shape: f32[1,128], index: 4, kind: input, shape index: {}]   ;;  %s1608_s5 = inlined_call_operand.hbm [shape: f32[2,16,128], index: 5, kind: output, shape index: {}]  }
   0x1   :  { %12 = vsyncpa [#allocation3 + $0x1], 0 }
   0x2   :  { %13 = vsyncpa [#allocation6], 0 }
   0x3   :  { %14 = vsyncpa [#allocation4], 0 }
   0x4   :  { %16 = vsyncpa [#allocation4 + $0x1], 0  ;;  %s1422_s18 = smov 0   ;;  %s1424_s19 = smov 0  }
   0x5   :  { %s1426_s20 = smov 0   ;;  %s1428_s21 = smov 0  }
   0x6 LB: > { %s1443_s22 = sadd.s32 4294967295, %s1383_s21   ;;  %s927_s23 = sadd.s32 4294967294, %s1383_s21   ;;  %s1383_s21 = sphi %s1428_s21, %s1620_s21   ;;  %s1379_s20 = sphi %s1426_s20, %s1619_s20   ;;  %s1375_s19 = sphi %s1424_s19, %s1618_s19   ;;  %s1371_s18 = sphi %s1422_s18, %s1617_s18  }
   0x7   : > { %p42_p0 = scmp.ne.s32.totalorder %s1375_s19, %s1371_s18  ;;  %p43_p1 = scmp.eq.s32.totalorder %s1443_s22, 0 }
   0x8   : > { %p150_p2 = scmp.eq.s32.totalorder %s1443_s22, 1  ;;  %p156_p3 = scmp.eq.s32.totalorder %s927_s23, 1 }
   0x9   : > { %p1452_p4 = por %p43_p1, %p42_p0  ;;  %p928_p5 = scmp.ge.s32.totalorder %s1383_s21, 1 }
   0xa   : > { %p1457_p6 = por %p156_p3, %p42_p0  ;;  %p163_p7 = scmp.lt.s32.totalorder %s1383_s21, 3 }
   0xb   : > { %s174_s28 = sshll.u32 %s1604_s1, 4  ;;  %s1385_s30 = smov [#allocation5]   ;;  %s175_s28 = int_to_ptr.hbm [resolvable:$true] %s174_s28 }
   0xc   : > { %p1465_p8 = pnand %p928_p5, %p163_p7  ;;  %s176_s6 = sshll.u32 %s1385_s30, 4  ;;  %s177_s6 = int_to_ptr.vmem [resolvable:$true] %s176_s6 }
   0xd   : > { %s191_s9 = sshll.u32 %s1606_s3, 4  ;;  %s1609_s10 = smov 64   ;;  %s192_s9 = int_to_ptr.hbm [resolvable:$true] %s191_s9 }
   0xe   : > { %p1161_p9 = pneg %p1465_p8  ;;  %s1387_s11 = smov 4  }
   0xf   : > { %s1388_s12 = smov [#allocation7]   ;;  %s1484_s14 = sadd.s32 1, %s1383_s21  }
  0x10   : > { %p1162_p10 = pnand %p1161_p9, %p43_p1  ;;  %s193_s13 = sshll.u32 %s1388_s12, 4  ;;  %s194_s13 = int_to_ptr.vmem [resolvable:$true] %s193_s13 }
  0x11   : > { %s29_s15 = sadd.s32 1, %s1379_s20  ;;  %s26_s16 = ssub.s32 %s1383_s21, %s1484_s14 }
  0x12   : > { %1164 = dma.hbm_to_vmem [thread:$0]  (!%p1162_p10), %s175_s28, 1536, %s177_s6, [#allocation6], %s1609_s10, %s1609_s10, %s1387_s11  }
  0x13   : > { %1167 = dma.hbm_to_vmem [thread:$0]  (!%p1162_p10), %s192_s9, 3072, %s194_s13, [#allocation6], %s1609_s10, %s1609_s10, %s1387_s11  }
  0x14   : > { %p36_p12 = scmp.ne.s32.totalorder %s1379_s20, %s1375_s19  ;;  %p27_p13 = scmp.eq.s32.totalorder %s26_s16, 0 }
  0x15   : > { %p37_p0 = scmp.eq.s32.totalorder %s1383_s21, 0  ;;  %p1178_p5 = scmp.lt.s32.totalorder %s1383_s21, 2 }
  0x16   : > { %p1494_p3 = por %p150_p2, %p36_p12  ;;  %s210_s26 = sand.u32 1, %s1379_s20  }
  0x17   : > { %s1500_s23 = scalar_select %p27_p13, %s1379_s20, %s29_s15  }
  0x18   : > { %p38_p7 = por %p37_p0, %p36_p12  ;;  %s932_s27 = sshll.u32 %s210_s26, 3 }
  0x19   : > { %s1110_s28 = sshll.u32 %s1383_s21, 3  ;;  %s214_s8 = scalar_lea.vmem [#allocation2], %s932_s27 }
  0x1a   : > { %s219_s7 = scalar_lea.hbm %s1603_s0, %s1110_s28  ;;  %s222_s9 = sshll.u32 %s214_s8, 4  ;;  %s223_s9 = int_to_ptr.vmem [resolvable:$true] %s222_s9 }
  0x1b   : > { %s220_s12 = sshll.u32 %s219_s7, 4  ;;  %p1507_p2 = pnand %p1178_p5, %p38_p7  ;;  %s221_s12 = int_to_ptr.hbm [resolvable:$true] %s220_s12 }
  0x1c   : > { %s211_s15 = scalar_lea.sflag [#allocation3], %s210_s26  ;;  %s1283_s16 = sshra.s32 %s221_s12, 4  ;;  %s1284_s16 = int_to_ptr.hbm [resolvable:$true] %s1283_s16 }
  0x1d   : > { %s1285_s10 = scalar_lea.hbm %s1284_s16, 8  ;;  %p1287_p10 = pneg %p1507_p2 }
  0x1e   : > { %p1286_p9 = scmp.ne.s32.totalorder %s1284_s16, %s1285_s10  ;;  %s1290_s30 = scalar_lea.hbm %s1603_s0, 16 }
  0x1f   : > { %p1291_p0 = scmp.lt.s32.totalorder %s1284_s16, %s1603_s0  ;;  %p1292_p5 = scmp.lt.s32.totalorder %s1290_s30, %s1285_s10 }
  0x20   : > { %p1288_p12 = pnand %p1287_p10, %p1286_p9 }
  0x21   : > { %p1293_p7 = por %p1292_p5, %p1291_p0 }
  0x22   : > { %p1289_p13 = pneg %p1288_p12 }
  0x24   : > { %p1294_p11 = pnand %p1293_p7, %p1289_p13 }
  0x26   : > { %1297 = shalt.err (!%p1294_p11)
}
  0x27   : > { %s1615_s26 = smov 64   ;;  %234 = sbr.rel (%p1465_p8) target bundleno = 671 (0x29f), region = 40 }
  0x28   : > { %1171 = dma.hbm_to_vmem [thread:$0]  (!%p1507_p2), %s221_s12, 128, %s223_s9, %s211_s15, %s1615_s26, %s1615_s26, %s1387_s11  }
  0x29   : > { %s1527_s8 = sand.u32 (!%p1465_p8), 1, %s1375_s19  }
  0x2a   : > { %s936_s16 = sshll.u32 (!%p1465_p8), %s1527_s8, 3  ;;  %s237_s10 = scalar_lea.sflag (!%p1465_p8), [#allocation3], %s1527_s8 }
  0x2b   : > { %s240_s28 = scalar_lea.vmem (!%p1465_p8), [#allocation2], %s936_s16 }
  0x2c   : > { %1358 = dma.done.wait (%p1452_p4), %s237_s10, 128  }
  0x2d   : > { %1360 = vsyncadd (%p1452_p4), %s237_s10, 4294967168 }
  0x2e   : > { %1362 = dma.done.wait (%p43_p1), [#allocation6], 4608  }
  0x2f   : > { %1364 = vsyncadd (%p43_p1), [#allocation6], 4294962688  ;;  %v1115_v0 = vld [vmem:[#allocation5 + $0x18] sm:$0xff]  ;;  %v1114_v2 = vld [vmem:[#allocation5 + $0x10] sm:$0xff]  ;;  %vm339_vm0 = vcmask 523264   ;;  %v279_v13 = vlaneseq  ;;  %v1389_v21 = vmov 0.0  }
  0x30   : > { %v1123_v1 = vld [vmem:[#allocation5 + $0x58] sm:$0xff]  ;;  %347 = vmatpush.bf16.msra.mxu0 %v1115_v0  ;;  %v1122_v3 = vld [vmem:[#allocation5 + $0x50] sm:$0xff]  ;;  %v1113_v5 = vld [vmem:[#allocation5 + $0x8] sm:$0xff]  ;;  %vm413_vm2 = vcmask 130048   ;;  %s939_s12 = sshll.u32 %s1527_s8, 4  ;;  %s1148_s13 = sshll.u32 %s1443_s22, 4 }
  0x31   : > { %403 = vmatpush.bf16.msra.mxu1 %v1123_v1  ;;  %v1119_v4 = vld [vmem:[#allocation5 + $0x38] sm:$0xff]  ;;  %v1121_v6 = vld [vmem:[#allocation5 + $0x48] sm:$0xff]  ;;  %v1112_v7 = vld [vmem:[#allocation5] sm:$0xff]  ;;  %v280_v14 = vshrl.u32 %v279_v13, 7  ;;  %v283_v17 = vand.u32 127, %v279_v13  ;;  %s831_s30 = scalar_lea.hbm %s1608_s5, %s1148_s13  ;;  %s277_s6 = scalar_lea.vmem [#allocation8], %s939_s12 }
  0x32   : > { %471 = vmatpush.bf16.msra.mxu3 %v1119_v4  ;;  %v1120_v8 = vld [vmem:[#allocation5 + $0x40] sm:$0xff]  ;;  %v1111_v9 = vld [vmem:[%s240_s28] sm:$0xff]  ;;  %v1117_v11 = vld [vmem:[#allocation5 + $0x28] sm:$0xff]  ;;  %s832_s7 = sshll.u32 %s277_s6, 4  ;;  %s834_s26 = sshll.u32 %s831_s30, 4  ;;  %s833_s7 = int_to_ptr.vmem [resolvable:$true] %s832_s7  ;;  %s835_s26 = int_to_ptr.hbm [resolvable:$true] %s834_s26 }
  0x33   : > { %v1118_v10 = vld [vmem:[#allocation5 + $0x30] sm:$0xff]  ;;  %v1116_v12 = vld [vmem:[#allocation5 + $0x20] sm:$0xff]  ;;  %v940_v18 = vadd.s32 4294967295, %v280_v14  ;;  %v281_v19 = vadd.s32 8, %v280_v14  ;;  %v292_v26 = vadd.s32 1, %v280_v14  ;;  %v1131_v30 = vld [vmem:[#allocation7 + $0x38] sm:$0xff] }
  0x34   : > { %348 = vmatpush.bf16.msra.mxu0 %v1114_v2  ;;  %v1147_v31 = vld [vmem:[#allocation7 + $0xb8] sm:$0xff]  ;;  %v1130_v33 = vld [vmem:[#allocation7 + $0x30] sm:$0xff]  ;;  %v1129_v36 = vld [vmem:[#allocation7 + $0x28] sm:$0xff]  ;;  %s820_s22 = scalar_lea.sflag [#allocation4], %s1527_s8  ;;  %s1327_s16 = sshra.s32 %s835_s26, 4  ;;  %s1328_s16 = int_to_ptr.hbm [resolvable:$true] %s1327_s16 }
  0x35   : > { %404 = vmatpush.bf16.msra.mxu1 %v1122_v3  ;;  %vm286_vm1 = vcmp.eq.s32.totalorder %v283_v17, %v940_v18  ;;  %v941_v24 = vadd.s32 4294967295, %v281_v19  ;;  %vm294_vm4 = vcmp.eq.s32.totalorder %v283_v17, %v292_v26  ;;  %v293_v28 = vadd.s32 1, %v281_v19  ;;  %v1139_v32 = vld [vmem:[#allocation7 + $0x78] sm:$0xff]  ;;  %v1146_v34 = vld [vmem:[#allocation7 + $0xb0] sm:$0xff]  ;;  %v1145_v37 = vld [vmem:[#allocation7 + $0xa8] sm:$0xff]  ;;  %s1329_s10 = scalar_lea.hbm %s1328_s16, 16  ;;  %p1334_p11 = scmp.lt.s32.totalorder %s1328_s16, %s1608_s5 }
  0x36   : > { %472 = vmatpush.bf16.msra.mxu3 %v1118_v10  ;;  %v1539_v22 = vsel %vm286_vm1, 1.0, %v1389_v21  ;;  %v1547_v27 = vsel %vm294_vm4, 1.0, %v1389_v21  ;;  %v1138_v35 = vld [vmem:[#allocation7 + $0x70] sm:$0xff]  ;;  %v1137_v38 = vld [vmem:[#allocation7 + $0x68] sm:$0xff]  ;;  %v1128_v39 = vld [vmem:[#allocation7 + $0x20] sm:$0xff]  ;;  %p1330_p1 = scmp.ne.s32.totalorder %s1328_s16, %s1329_s10  ;;  %s1333_s29 = scalar_lea.hbm %s1608_s5, 32 }
  0x37   : > { %vm287_vm3 = vcmp.eq.s32.totalorder %v283_v17, %v941_v24  ;;  %vm295_vm5 = vcmp.eq.s32.totalorder %v283_v17, %v293_v28  ;;  %v1144_v40 = vld [vmem:[#allocation7 + $0xa0] sm:$0xff]  ;;  %v1127_v42 = vld [vmem:[#allocation7 + $0x18] sm:$0xff]  ;;  %v1126_v45 = vld [vmem:[#allocation7 + $0x10] sm:$0xff]  ;;  %p1335_p2 = scmp.lt.s32.totalorder %s1333_s29, %s1329_s10 }
  0x38   : > { %349 = vmatpush.bf16.msra.mxu0 %v1113_v5  ;;  %v1543_v25 = vsel %vm287_vm3, 1.0, %v1389_v21  ;;  %v1551_v29 = vsel %vm295_vm5, 1.0, %v1389_v21  ;;  %v1136_v41 = vld [vmem:[#allocation7 + $0x60] sm:$0xff]  ;;  %v1143_v43 = vld [vmem:[#allocation7 + $0x98] sm:$0xff]  ;;  %v1142_v46 = vld [vmem:[#allocation7 + $0x90] sm:$0xff]  ;;  %p1331_p4 = pnand %p1330_p1, %p1494_p3 }
  0x39   : > { %405 = vmatpush.bf16.msra.mxu1 %v1121_v6  ;;  %v1135_v44 = vld [vmem:[#allocation7 + $0x58] sm:$0xff]  ;;  %v1134_v47 = vld [vmem:[#allocation7 + $0x50] sm:$0xff]  ;;  %v1125_v48 = vld [vmem:[#allocation7 + $0x8] sm:$0xff]  ;;  %p1336_p9 = por %p1335_p2, %p1334_p11 }
  0x3a   : > { %473 = vmatpush.bf16.msra.mxu3 %v1117_v11  ;;  %v1141_v49 = vld [vmem:[#allocation7 + $0x88] sm:$0xff]  ;;  %v1124_v51 = vld [vmem:[#allocation7] sm:$0xff]  ;;  %v1221_v60 = vld [vmem:[%s1605_s2] ss:$0 sm:$0xff]  ;;  %p1332_p8 = pneg %p1331_p4 }
  0x3b   : > { %v1133_v50 = vld [vmem:[#allocation7 + $0x48] sm:$0xff]  ;;  %v1140_v52 = vld [vmem:[#allocation7 + $0x80] sm:$0xff] }
  0x3c   : > { %350 = vmatpush.bf16.msra.mxu0 %v1112_v7  ;;  %v1132_v53 = vld [vmem:[#allocation7 + $0x40] sm:$0xff]  ;;  %p1337_p10 = pnand %p1336_p9, %p1332_p8 }
  0x3d   : > { %406 = vmatpush.bf16.msra.mxu1 %v1120_v8 }
  0x3e   : > { %474 = vmatpush.bf16.msra.mxu3 %v1116_v12 }
  0x3f   : > { %966 = vmatmul.msk.bf16.vlgmr.msra.gmra.mxu0 %vm339_vm0, %v1111_v9 }
  0x40   : > { %983 = vmatmul.msk.bf16.vlgmr.msra.gmra.mxu1 %vm339_vm0, %v1111_v9  ;;  %587 = vmatpush.bf16.msrb.mxu0 %v1131_v30 }
  0x41   : > { %1002 = vmatmul.msk.bf16.vlgmr.msra.gmra.mxu3 %vm339_vm0, %v1111_v9  ;;  %683 = vmatpush.bf16.msrb.mxu1 %v1147_v31 }
  0x44   : > { %588 = vmatpush.bf16.msrb.mxu0 %v1130_v33 }
  0x45   : > { %684 = vmatpush.bf16.msrb.mxu1 %v1146_v34 }
  0x48   : > { %589 = vmatpush.bf16.msrb.mxu0 %v1129_v36 }
  0x49   : > { %685 = vmatpush.bf16.msrb.mxu1 %v1145_v37 }
  0x4c   : > { %590 = vmatpush.bf16.msrb.mxu0 %v1128_v39 }
  0x4d   : > { %686 = vmatpush.bf16.msrb.mxu1 %v1144_v40 }
  0x50   : > { %591 = vmatpush.bf16.msrb.mxu0 %v1127_v42 }
  0x51   : > { %687 = vmatpush.bf16.msrb.mxu1 %v1143_v43 }
  0x54   : > { %592 = vmatpush.bf16.msrb.mxu0 %v1126_v45 }
  0x55   : > { %688 = vmatpush.bf16.msrb.mxu1 %v1142_v46 }
  0x58   : > { %593 = vmatpush.bf16.msrb.mxu0 %v1125_v48 }
  0x59   : > { %689 = vmatpush.bf16.msrb.mxu1 %v1141_v49 }
  0x5c   : > { %594 = vmatpush.bf16.msrb.mxu0 %v1124_v51 }
  0x5d   : > { %690 = vmatpush.bf16.msrb.mxu1 %v1140_v52 }
  0xbc   : > { %v352_v15 = vpop.f32.mrf.mxu0 }
  0xbd   : > { %v408_v16 = vpop.f32.mrf.mxu1 }
  0xc4   : > { %v354_v20 = vpop.f32.mrf.mxu0  ;;  %v476_v56 = vpop.f32.mrf.mxu3 }
  0xc5   : > { %434 = vmatpush.msra.mxu2 %v354_v20  ;;  %v410_v23 = vpop.f32.mrf.mxu1 }
  0xc7   : > { %435 = vmatpush.msra.mxu2 %v352_v15 }
  0xc8   : > { %984 = vmatmul.msk.f32.vlgmr.msra.gmra.mxu2 %vm413_vm2, %v1539_v22 }
  0xc9   : > { %501 = vmatpush.msrb.mxu2 %v410_v23 }
  0xcb   : > { %502 = vmatpush.msrb.mxu2 %v408_v16  ;;  %v1222_v16 = vld [vmem:[%s1607_s4] ss:$0 sm:$0xff] }
  0xcc   : > { %v478_v61 = vpop.f32.mrf.mxu3 }
  0xcd   : > { %768 = vmatpush.bf16.msra.mxu2 %v1139_v32 }
  0xd0   : > { %985 = vmatmul.msk.f32.gmra.mxu2 %vm413_vm2, %v1543_v25 }
  0xd1   : > { %769 = vmatpush.bf16.msra.mxu2 %v1138_v35 }
  0xd5   : > { %770 = vmatpush.bf16.msra.mxu2 %v1137_v38 }
  0xd8   : > { %1003 = vmatmul.msk.f32.vlgmr.msrb.gmra.mxu2 %vm413_vm2, %v1547_v27 }
  0xd9   : > { %771 = vmatpush.bf16.msra.mxu2 %v1136_v41 }
  0xdd   : > { %772 = vmatpush.bf16.msra.mxu2 %v1135_v44 }
  0xe0   : > { %1004 = vmatmul.msk.f32.gmra.mxu2 %vm413_vm2, %v1551_v29 }
  0xe1   : > { %773 = vmatpush.bf16.msra.mxu2 %v1134_v47 }
  0xe5   : > { %774 = vmatpush.bf16.msra.mxu2 %v1133_v50 }
  0xe9   : > { %775 = vmatpush.bf16.msra.mxu2 %v1132_v53 }
 0x14b   : > { %v437_v54 = vpop.f32.mrf.mxu2 }
 0x14c   : > { %v477_v58 = vadd.f32 %v476_v56, %v437_v54 }
 0x153   : > { %v440_v55 = vpop.f32.mrf.mxu2 }
 0x154   : > { %v479_v62 = vadd.f32 %v478_v61, %v440_v55 }
 0x15b   : > { %v504_v57 = vpop.f32.mrf.mxu2 }
 0x15c   : > { %v510_v59 = vadd.f32 %v504_v57, %v477_v58 }
 0x15e   : > { %v516_v63 = vadd.f32 %v1221_v60, %v510_v59 }
 0x160   : > { %v518_v2 = vmul.f32 0.2, %v516_v63 }
 0x162   : > { %v520_v5 = vmax.f32 %v518_v2, %v516_v63 }
 0x163   : > { %v507_v0 = vpop.f32.mrf.mxu2 }
 0x164   : > { %v511_v1 = vadd.f32 %v507_v0, %v479_v62 }
 0x166   : > { %v517_v3 = vadd.f32 %v1221_v60, %v511_v1 }
 0x168   : > { %v519_v4 = vmul.f32 0.2, %v517_v3 }
 0x16a   : > { %v521_v6 = vmax.f32 %v519_v4, %v517_v3 }
 0x16c   : > { %v522_v7 = vpack.c.bf16 %v521_v6, %v520_v5 }
 0x16e   : > { %595 = vmatmul.bf16.vlgmr.msrb.gmra.mxu0 %v522_v7  ;;  %691 = vmatmul.bf16.vlgmr.msrb.gmra.mxu1 %v522_v7 }
 0x16f   : > { %776 = vmatmul.bf16.vlgmr.msra.gmra.mxu2 %v522_v7 }
 0x1eb   : > { %v596_v8 = vpop.f32.mrf.mxu0  ;;  %v692_v9 = vpop.f32.mrf.mxu1 }
 0x1f2   : > { %v777_v14 = vpop.f32.mrf.mxu2 }
 0x1f3   : > { %v598_v10 = vpop.f32.mrf.mxu0  ;;  %v694_v11 = vpop.f32.mrf.mxu1 }
 0x1f4   : > { %711 = vmatpush.msrb.mxu3 %v598_v10 }
 0x1f6   : > { %712 = vmatpush.msrb.mxu3 %v596_v8 }
 0x1f7   : > { %1069 = vmatmul.msk.f32.vlgmr.msrb.gmra.mxu3 %vm413_vm2, %v1539_v22 }
 0x1f8   : > { %796 = vmatpush.msra.mxu3 %v694_v11 }
 0x1fa   : > { %797 = vmatpush.msra.mxu3 %v692_v9  ;;  %v779_v21 = vpop.f32.mrf.mxu2 }
 0x1ff   : > { %1070 = vmatmul.msk.f32.gmra.mxu3 %vm413_vm2, %v1543_v25 }
 0x207   : > { %1103 = vmatmul.msk.f32.vlgmr.msra.gmra.mxu3 %vm413_vm2, %v1547_v27 }
 0x20f   : > { %1104 = vmatmul.msk.f32.gmra.mxu3 %vm413_vm2, %v1551_v29 }
 0x27a   : > { %v714_v12 = vpop.f32.mrf.mxu3 }
 0x27b   : > { %v778_v15 = vadd.f32 %v777_v14, %v714_v12 }
 0x282   : > { %v717_v13 = vpop.f32.mrf.mxu3 }
 0x283   : > { %v780_v22 = vadd.f32 %v779_v21, %v717_v13 }
 0x28a   : > { %v799_v17 = vpop.f32.mrf.mxu3 }
 0x28b   : > { %v805_v18 = vadd.f32 %v799_v17, %v778_v15 }
 0x28d   : > { %v811_v19 = vadd.f32 %v1222_v16, %v805_v18 }
 0x28f   : > { %v813_v20 = vmul.f32 0.2, %v811_v19 }
 0x291   : > { %v815_v23 = vmax.f32 %v813_v20, %v811_v19 }
 0x292   : > { %v802_v24 = vpop.f32.mrf.mxu3 }
 0x293   : > { %817 = vst [vmem:[%s277_s6] sm:$0xff] %v815_v23  ;;  %v806_v25 = vadd.f32 %v802_v24, %v780_v22 }
 0x295   : > { %v812_v26 = vadd.f32 %v1222_v16, %v806_v25 }
 0x297   : > { %v814_v27 = vmul.f32 0.2, %v812_v26 }
 0x299   : > { %v816_v28 = vmax.f32 %v814_v27, %v812_v26 }
 0x29b   : > { %818 = vst [vmem:[%s277_s6 + $0x8] sm:$0xff] %v816_v28 }
 0x29c   : > { %1340 = shalt.err (!%p1337_p10)
}
 0x29d   : > { %s1390_s8 = smov 128   ;;  %s1391_s12 = smov 8  }
 0x29e   : > { %1159 = dma.vmem_to_hbm [thread:$0]  (%p1494_p3), %s833_s7, 256, %s835_s26, %s820_s22, %s1390_s8, %s1390_s8, %s1391_s12  }
 0x29f PF: > { %s849_s13 = sand.u32 1, %s1371_s18   ;;  %p1616_p12 = scmp.ge.s32.totalorder %s1383_s21, 2 }
 0x2a0   : > { %s850_s15 = scalar_lea.sflag [#allocation4], %s849_s13 }
 0x2a1   : > { %p1173_p13 = pnand %p1616_p12, %p1457_p6 }
 0x2a3   : > { %p1174_p0 = pneg %p1173_p13 }
 0x2a5   : > { %1366 = dma.done.wait (%p1174_p0), %s850_s15, 256  }
 0x2a6   : > { %1368 = vsyncadd (%p1174_p0), %s850_s15, 4294967040  ;;  %p19_p5 = scmp.ge.s32.totalorder %s1484_s14, 4   ;;  %s1617_s18 = smov %s1375_s19 }
 0x2a7   : > { %s1618_s19 = smov %s1379_s20  ;;  %s1619_s20 = smov %s1500_s23 }
 0x2a8   : > { %s1620_s21 = smov %s1484_s14  ;;  %21 = sbr.rel (!%p19_p5) target bundleno = 6 (0x6), region = 97 }
 0x2ad   :  { %856 = vsyncpa [#allocation3], 1 }
 0x2ae   :  { %858 = vsyncpa [#allocation3 + $0x1], 1 }
 0x2af   :  { %859 = vsyncpa [#allocation6], 1 }
 0x2b0   :  { %860 = vsyncpa [#allocation4], 1 }
 0x2b1   :  { %862 = vsyncpa [#allocation4 + $0x1], 1 }

</bundles_post_ra>
